<compile_context>
chip_gen: v7x
topology: tpu7x:2x2x1
jax: 0.10.0
libtpu: 0.0.40
codegen_flags: <defaults>
</compile_context>

<pallas_src>
import functools

import jax
import jax.numpy as jnp
from jax import lax
from jax.experimental import pallas as pl
from jax.experimental.pallas import tpu as pltpu

_ND = 8        # 3 pos + 4 quat + 1 gripper
_LANES = 128   # action vectors per row = 128 // 8 = 16

# Loss-neutral padding elements (used only for ragged batch sizes):
#   pos: 0 vs 0 -> SE 0 ; quat: identity vs identity -> 1 - d^2 ~ 0 ;
#   gripper: logit -30 vs label 0 -> BCE ~ 9e-14.
_PAD_PRED = (0.0, 0.0, 0.0, 1.0, 0.0, 0.0, 0.0, -30.0)
_PAD_TGT = (0.0, 0.0, 0.0, 1.0, 0.0, 0.0, 0.0, 0.0)


def _round_up(x: int, m: int) -> int:
    return ((x + m - 1) // m) * m


def _make_kernel(accumulate: bool):
    """Builds the loss kernel. Refs: p_ref/t_ref (block_r, 128), out_ref (3, 128)."""

    def kernel(p_ref, t_ref, out_ref):
        p = p_ref[...].astype(jnp.float32)   # (R, 128)
        t = t_ref[...].astype(jnp.float32)

        lane = lax.broadcasted_iota(jnp.int32, (1, _LANES), 1)
        dim = lane % _ND                                   # action-dim per lane
        pos_m = (dim < 3).astype(jnp.float32)              # (1, 128)
        grip_m = (dim == _ND - 1).astype(jnp.float32)      # (1, 128)
        quat_m = jnp.logical_and(dim >= 3, dim <= 6).astype(jnp.float32)

        def win4(x):
            # Sum over a contiguous 4-lane window (direction set by HW roll).
            s = x + pltpu.roll(x, 1, axis=1)
            return s + pltpu.roll(s, 2, axis=1)

        # ---- position: squared error over dims 0..2 ----
        pd = p - t
        pos_part = pos_m * jnp.sum(pd * pd, axis=0, keepdims=True)   # (1, 128)

        # ---- rotation: 1 - (normalized-quat dot)^2 per action vector ----
        # win4 applied to the constant quat mask selects the single lane per
        # 8-lane group whose window covers exactly that group's 4 quat lanes,
        # independent of the hardware roll direction.
        pick = win4(quat_m) == 4.0                                   # (1, 128)
        pp = win4(p * p)                                             # (R, 128)
        tt = win4(t * t)
        pt = win4(p * t)
        d = pt * lax.rsqrt(pp * tt + 1e-12)   # EUP rsqrt instead of 2x sqrt + div
        rot = jnp.where(pick, 1.0 - d * d, 0.0)
        rot_part = jnp.sum(rot, axis=0, keepdims=True)               # (1, 128)

        # ---- gripper: numerically stable BCE-with-logits on dim 7 ----
        bce = jnp.maximum(p, 0.0) - p * t + jnp.log1p(jnp.exp(-jnp.abs(p)))
        grip_part = grip_m * jnp.sum(bce, axis=0, keepdims=True)     # (1, 128)

        if accumulate:
            @pl.when(pl.program_id(1) == 0)
            def _init():
                out_ref[...] = jnp.zeros_like(out_ref)

            out_ref[0:1, :] += pos_part
            out_ref[1:2, :] += rot_part
            out_ref[2:3, :] += grip_part
        else:  # single inner step: write directly, no init/accumulate branches
            out_ref[0:1, :] = pos_part
            out_ref[1:2, :] = rot_part
            out_ref[2:3, :] = grip_part

    return kernel


@functools.partial(jax.jit, static_argnames=("pos_weight", "rot_weight",
                                             "gripper_weight", "max_block_rows"))
def custom_loss(pred, target, pos_weight=1.0, rot_weight=1.0, gripper_weight=1.0,
                max_block_rows=2048):
    """pred, target: (B, 1, 8) -> (total, pos_loss, rot_loss, gripper_loss)."""
    B = pred.shape[0]
    assert pred.shape[-1] == _ND, f"expected last dim {_ND}, got {pred.shape[-1]}"
    n = B * _ND

    # Free row-major reshape: no transpose, no HBM relayout pass.
    flat_p = pred.reshape(n)
    flat_t = target.reshape(n)

    rows = pl.cdiv(n, _LANES)
    # Outer "parallel" axis: 2 batch chunks so a 2-TensorCore chip (v7x megacore)
    # can split the work; runs serially (nearly free) on 1-TC chips.
    P = 2 if rows >= 16 else 1
    rows_per_chunk = _round_up(pl.cdiv(rows, P), 8)
    block_r = min(max_block_rows, rows_per_chunk)
    K = pl.cdiv(rows_per_chunk, block_r)
    rows_padded = P * K * block_r
    n_padded = rows_padded * _LANES

    if n_padded != n:  # ragged batch: pad with loss-neutral action vectors
        reps = (n_padded - n) // _ND
        pad_p = jnp.tile(jnp.asarray(_PAD_PRED, dtype=flat_p.dtype), reps)
        pad_t = jnp.tile(jnp.asarray(_PAD_TGT, dtype=flat_t.dtype), reps)
        flat_p = jnp.concatenate([flat_p, pad_p])
        flat_t = jnp.concatenate([flat_t, pad_t])

    p2 = flat_p.reshape(rows_padded, _LANES)
    t2 = flat_t.reshape(rows_padded, _LANES)

    kernel = _make_kernel(accumulate=(K > 1))

    itemsize = jnp.dtype(pred.dtype).itemsize
    cost = pl.CostEstimate(
        flops=int(30 * n_padded),
        transcendentals=int(3 * n_padded),
        bytes_accessed=int(2 * n_padded * itemsize + P * 3 * _LANES * 4),
    )

    parts = pl.pallas_call(
        kernel,
        out_shape=jax.ShapeDtypeStruct((P, 3, _LANES), jnp.float32),
        grid=(P, K),
        in_specs=[
            pl.BlockSpec((block_r, _LANES), lambda o, k, K=K: (o * K + k, 0)),
            pl.BlockSpec((block_r, _LANES), lambda o, k, K=K: (o * K + k, 0)),
        ],
        out_specs=pl.BlockSpec((None, 3, _LANES), lambda o, k: (o, 0, 0)),
        compiler_params=pltpu.CompilerParams(
            dimension_semantics=("parallel", "arbitrary"),
            vmem_limit_bytes=32 * 1024 * 1024),
        cost_estimate=cost,
    )(p2, t2)

    # Tiny epilogue in JAX (per-core / per-lane partials -> scalars + weighting).
    sums = jnp.sum(parts, axis=(0, 2))            # (3,)
    pos_loss = sums[0] / (3.0 * B)                # MSE over B*3 elements
    rot_loss = sums[1] / float(B)
    grip_loss = sums[2] / float(B)
    total = (pos_weight * pos_loss + rot_weight * rot_loss
             + gripper_weight * grip_loss)
    return total, pos_loss, rot_loss, grip_loss


def _reference(pred, target, pos_weight=1.0, rot_weight=1.0, gripper_weight=1.0):
    B = pred.shape[0]
    p = pred.reshape(B, _ND).astype(jnp.float32)
    t = target.reshape(B, _ND).astype(jnp.float32)
    pos = jnp.mean((p[:, :3] - t[:, :3]) ** 2)
    prn = p[:, 3:7] / (jnp.linalg.norm(p[:, 3:7], axis=1, keepdims=True) + 1e-8)
    trn = t[:, 3:7] / (jnp.linalg.norm(t[:, 3:7], axis=1, keepdims=True) + 1e-8)
    d = jnp.sum(prn * trn, axis=1, keepdims=True)
    rot = jnp.mean(1.0 - d * d)
    x, z = p[:, 7:], t[:, 7:]
    grip = jnp.mean(jnp.maximum(x, 0.0) - x * z + jnp.log1p(jnp.exp(-jnp.abs(x))))
    total = pos_weight * pos + rot_weight * rot + gripper_weight * grip
    return total, pos, rot, grip


if __name__ == "__main__":
    key = jax.random.PRNGKey(0)
    k1, k2, k3, k4, k5, k6, k7, k8 = jax.random.split(key, 8)

    # ---- case 1: module-sized input (B=2), single tile, ragged padding ----
    B = 2
    pred = jax.random.normal(k1, (B, 1, _ND), dtype=jnp.float32)
    target = jax.random.normal(k2, (B, 1, _ND), dtype=jnp.float32)
    target = target.at[:, 0, 7].set(jnp.array([0.0, 1.0], dtype=jnp.float32))

    outs = custom_loss(pred, target)
    jax.block_until_ready(outs[0])
    refs = _reference(pred, target)
    for got, want in zip(outs, refs):
        assert jnp.allclose(got, want, atol=1e-5, rtol=1e-5), (got, want)

    # ---- case 2: B=300 -> P=2 parallel chunks, ragged neutral padding ----
    B2 = 300
    pred2 = jax.random.normal(k3, (B2, 1, _ND), dtype=jnp.float32)
    target2 = jax.random.normal(k4, (B2, 1, _ND), dtype=jnp.float32)
    labels2 = (jax.random.uniform(k5, (B2,)) > 0.5).astype(jnp.float32)
    target2 = target2.at[:, 0, 7].set(labels2)

    outs2 = custom_loss(pred2, target2, pos_weight=2.0, rot_weight=0.5,
                        gripper_weight=1.5)
    jax.block_until_ready(outs2[0])
    refs2 = _reference(pred2, target2, 2.0, 0.5, 1.5)
    for got, want in zip(outs2, refs2):
        assert jnp.allclose(got, want, atol=1e-5, rtol=1e-5), (got, want)

    # ---- case 3: B=1024, small blocks -> multi-step inner reduction (K>1),
    #      no padding, accumulate-into-output path ----
    B3 = 1024
    pred3 = jax.random.normal(k6, (B3, 1, _ND), dtype=jnp.float32)
    target3 = jax.random.normal(k7, (B3, 1, _ND), dtype=jnp.float32)
    labels3 = (jax.random.uniform(k8, (B3,)) > 0.5).astype(jnp.float32)
    target3 = target3.at[:, 0, 7].set(labels3)

    outs3 = custom_loss(pred3, target3, max_block_rows=8)
    jax.block_until_ready(outs3[0])
    refs3 = _reference(pred3, target3)
    for got, want in zip(outs3, refs3):
        assert jnp.allclose(got, want, atol=1e-5, rtol=1e-5), (got, want)

    print("KERNEL_OK")
</pallas_src>

<mosaic_0001>
module attributes {stable_mosaic.version = 11 : i64} {
  func.func @kernel(%arg0: i32, %arg1: i32, %arg2: memref<8x128xf32, #tpu.memory_space<vmem>>, %arg3: memref<8x128xf32, #tpu.memory_space<vmem>>, %arg4: memref<1x3x128xf32, #tpu.memory_space<vmem>>) attributes {dimension_semantics = [#tpu.dimension_semantics<parallel>, #tpu.dimension_semantics<arbitrary>], iteration_bounds = array<i64: 1, 1>, scalar_prefetch = 0 : i64, scratch_operands = 0 : i64, tpu.core_type = #tpu.core_type<tc>, window_params = [{transform_indices = @transform_0, window_bounds = array<i64: 8, 128>}, {transform_indices = @transform_1, window_bounds = array<i64: 8, 128>}, {transform_indices = @transform_2, window_bounds = array<i64: 1, 3, 128>}]} {
    %c0 = arith.constant 0 : index
    %c0_0 = arith.constant 0 : index
    %0 = vector.load %arg2[%c0, %c0_0] : memref<8x128xf32, #tpu.memory_space<vmem>>, vector<8x128xf32>
    %c0_1 = arith.constant 0 : index
    %c0_2 = arith.constant 0 : index
    %1 = vector.load %arg3[%c0_1, %c0_2] : memref<8x128xf32, #tpu.memory_space<vmem>>, vector<8x128xf32>
    %2 = tpu.iota {dimensions = array<i32: 1>} : vector<1x128xi32>
    %c8_i32 = arith.constant 8 : i32
    %c0_i32 = arith.constant 0 : i32
    %3 = arith.cmpi eq, %c8_i32, %c0_i32 : i32
    %c1_i32 = arith.constant 1 : i32
    %4 = arith.select %3, %c1_i32, %c8_i32 : i32
    %5 = vector.broadcast %4 : i32 to vector<1x128xi32>
    %6 = arith.remsi %2, %5 : vector<1x128xi32>
    %c0_i32_3 = arith.constant 0 : i32
    %7 = vector.broadcast %c0_i32_3 : i32 to vector<1x128xi32>
    %8 = arith.cmpi ne, %6, %7 : vector<1x128xi32>
    %c0_i32_4 = arith.constant 0 : i32
    %9 = vector.broadcast %c0_i32_4 : i32 to vector<1x128xi32>
    %10 = arith.cmpi slt, %6, %9 : vector<1x128xi32>
    %c0_i32_5 = arith.constant 0 : i32
    %11 = arith.cmpi slt, %4, %c0_i32_5 : i32
    %12 = vector.broadcast %11 : i1 to vector<1x128xi1>
    %13 = vector.broadcast %12 : vector<1x128xi1> to vector<1x128xi1>
    %14 = arith.xori %10, %13 : vector<1x128xi1>
    %15 = arith.andi %14, %8 : vector<1x128xi1>
    %16 = vector.broadcast %4 : i32 to vector<1x128xi32>
    %17 = arith.addi %6, %16 : vector<1x128xi32>
    %18 = arith.select %15, %17, %6 : vector<1x128xi1>, vector<1x128xi32>
    %c3_i32 = arith.constant 3 : i32
    %19 = vector.broadcast %c3_i32 : i32 to vector<1x128xi32>
    %20 = arith.cmpi slt, %18, %19 : vector<1x128xi32>
    %21 = arith.extui %20 : vector<1x128xi1> to vector<1x128xi32>
    %22 = arith.sitofp %21 : vector<1x128xi32> to vector<1x128xf32>
    %c7_i32 = arith.constant 7 : i32
    %23 = vector.broadcast %c7_i32 : i32 to vector<1x128xi32>
    %24 = arith.cmpi eq, %18, %23 : vector<1x128xi32>
    %25 = arith.extui %24 : vector<1x128xi1> to vector<1x128xi32>
    %26 = arith.sitofp %25 : vector<1x128xi32> to vector<1x128xf32>
    %c3_i32_6 = arith.constant 3 : i32
    %27 = vector.broadcast %c3_i32_6 : i32 to vector<1x128xi32>
    %28 = arith.cmpi sge, %18, %27 : vector<1x128xi32>
    %c6_i32 = arith.constant 6 : i32
    %29 = vector.broadcast %c6_i32 : i32 to vector<1x128xi32>
    %30 = arith.cmpi sle, %18, %29 : vector<1x128xi32>
    %31 = arith.andi %28, %30 : vector<1x128xi1>
    %32 = arith.extui %31 : vector<1x128xi1> to vector<1x128xi32>
    %33 = arith.sitofp %32 : vector<1x128xi32> to vector<1x128xf32>
    %34 = arith.subf %0, %1 : vector<8x128xf32>
    %35 = arith.mulf %34, %34 : vector<8x128xf32>
    %cst = arith.constant dense<0.000000e+00> : vector<128xf32>
    %36 = vector.multi_reduction <add>, %35, %cst [0] : vector<8x128xf32> to vector<128xf32>
    %37 = vector.shape_cast %36 : vector<128xf32> to vector<1x128xf32>
    %38 = arith.mulf %22, %37 : vector<1x128xf32>
    %c1_i32_7 = arith.constant 1 : i32
    %39 = tpu.dynamic_rotate %33 by %c1_i32_7 dim 1 : vector<1x128xf32>, i32 -> vector<1x128xf32>
    %40 = arith.addf %33, %39 : vector<1x128xf32>
    %c2_i32 = arith.constant 2 : i32
    %41 = tpu.dynamic_rotate %40 by %c2_i32 dim 1 : vector<1x128xf32>, i32 -> vector<1x128xf32>
    %42 = arith.addf %40, %41 : vector<1x128xf32>
    %cst_8 = arith.constant 4.000000e+00 : f32
    %43 = vector.broadcast %cst_8 : f32 to vector<1x128xf32>
    %44 = arith.cmpf oeq, %42, %43 : vector<1x128xf32>
    %45 = arith.mulf %0, %0 : vector<8x128xf32>
    %c1_i32_9 = arith.constant 1 : i32
    %46 = tpu.dynamic_rotate %45 by %c1_i32_9 dim 1 : vector<8x128xf32>, i32 -> vector<8x128xf32>
    %47 = arith.addf %45, %46 : vector<8x128xf32>
    %c2_i32_10 = arith.constant 2 : i32
    %48 = tpu.dynamic_rotate %47 by %c2_i32_10 dim 1 : vector<8x128xf32>, i32 -> vector<8x128xf32>
    %49 = arith.addf %47, %48 : vector<8x128xf32>
    %50 = arith.mulf %1, %1 : vector<8x128xf32>
    %c1_i32_11 = arith.constant 1 : i32
    %51 = tpu.dynamic_rotate %50 by %c1_i32_11 dim 1 : vector<8x128xf32>, i32 -> vector<8x128xf32>
    %52 = arith.addf %50, %51 : vector<8x128xf32>
    %c2_i32_12 = arith.constant 2 : i32
    %53 = tpu.dynamic_rotate %52 by %c2_i32_12 dim 1 : vector<8x128xf32>, i32 -> vector<8x128xf32>
    %54 = arith.addf %52, %53 : vector<8x128xf32>
    %55 = arith.mulf %0, %1 : vector<8x128xf32>
    %c1_i32_13 = arith.constant 1 : i32
    %56 = tpu.dynamic_rotate %55 by %c1_i32_13 dim 1 : vector<8x128xf32>, i32 -> vector<8x128xf32>
    %57 = arith.addf %55, %56 : vector<8x128xf32>
    %c2_i32_14 = arith.constant 2 : i32
    %58 = tpu.dynamic_rotate %57 by %c2_i32_14 dim 1 : vector<8x128xf32>, i32 -> vector<8x128xf32>
    %59 = arith.addf %57, %58 : vector<8x128xf32>
    %60 = arith.mulf %49, %54 : vector<8x128xf32>
    %cst_15 = arith.constant 9.99999996E-13 : f32
    %61 = vector.broadcast %cst_15 : f32 to vector<8x128xf32>
    %62 = arith.addf %60, %61 : vector<8x128xf32>
    %63 = math.rsqrt %62 : vector<8x128xf32>
    %64 = arith.mulf %59, %63 : vector<8x128xf32>
    %65 = arith.mulf %64, %64 : vector<8x128xf32>
    %cst_16 = arith.constant 1.000000e+00 : f32
    %66 = vector.broadcast %cst_16 : f32 to vector<8x128xf32>
    %67 = arith.subf %66, %65 : vector<8x128xf32>
    %cst_17 = arith.constant 0.000000e+00 : f32
    %68 = vector.shape_cast %44 : vector<1x128xi1> to vector<1x128xi1>
    %69 = vector.broadcast %68 : vector<1x128xi1> to vector<8x128xi1>
    %70 = vector.broadcast %cst_17 : f32 to vector<8x128xf32>
    %71 = arith.select %69, %67, %70 : vector<8x128xi1>, vector<8x128xf32>
    %cst_18 = arith.constant dense<0.000000e+00> : vector<128xf32>
    %72 = vector.multi_reduction <add>, %71, %cst_18 [0] : vector<8x128xf32> to vector<128xf32>
    %73 = vector.shape_cast %72 : vector<128xf32> to vector<1x128xf32>
    %cst_19 = arith.constant 0.000000e+00 : f32
    %74 = vector.broadcast %cst_19 : f32 to vector<8x128xf32>
    %75 = arith.maximumf %0, %74 : vector<8x128xf32>
    %76 = arith.mulf %0, %1 : vector<8x128xf32>
    %77 = arith.subf %75, %76 : vector<8x128xf32>
    %78 = math.absf %0 : vector<8x128xf32>
    %cst_20 = arith.constant 0.000000e+00 : f32
    %79 = vector.broadcast %cst_20 : f32 to vector<8x128xf32>
    %80 = arith.subf %79, %78 : vector<8x128xf32>
    %81 = math.exp %80 : vector<8x128xf32>
    %82 = math.log1p %81 : vector<8x128xf32>
    %83 = arith.addf %77, %82 : vector<8x128xf32>
    %cst_21 = arith.constant dense<0.000000e+00> : vector<128xf32>
    %84 = vector.multi_reduction <add>, %83, %cst_21 [0] : vector<8x128xf32> to vector<128xf32>
    %85 = vector.shape_cast %84 : vector<128xf32> to vector<1x128xf32>
    %86 = arith.mulf %26, %85 : vector<1x128xf32>
    %c0_22 = arith.constant 0 : index
    %c0_23 = arith.constant 0 : index
    %c0_24 = arith.constant 0 : index
    %87 = vector.load %arg4[%c0_22, %c0_23, %c0_24] : memref<1x3x128xf32, #tpu.memory_space<vmem>>, vector<1x1x128xf32>
    %88 = vector.shape_cast %87 : vector<1x1x128xf32> to vector<1x128xf32>
    %89 = vector.shape_cast %38 : vector<1x128xf32> to vector<1x1x128xf32>
    tpu.vector_store %arg4[%c0_22, %c0_23, %c0_24], %89 {strides = array<i32>} : memref<1x3x128xf32, #tpu.memory_space<vmem>>, vector<1x1x128xf32>,
    %c0_25 = arith.constant 0 : index
    %c1 = arith.constant 1 : index
    %c0_26 = arith.constant 0 : index
    %90 = vector.load %arg4[%c0_25, %c1, %c0_26] : memref<1x3x128xf32, #tpu.memory_space<vmem>>, vector<1x1x128xf32>
    %91 = vector.shape_cast %90 : vector<1x1x128xf32> to vector<1x128xf32>
    %92 = vector.shape_cast %73 : vector<1x128xf32> to vector<1x1x128xf32>
    tpu.vector_store %arg4[%c0_25, %c1, %c0_26], %92 {strides = array<i32>} : memref<1x3x128xf32, #tpu.memory_space<vmem>>, vector<1x1x128xf32>,
    %c0_27 = arith.constant 0 : index
    %c2 = arith.constant 2 : index
    %c0_28 = arith.constant 0 : index
    %93 = vector.load %arg4[%c0_27, %c2, %c0_28] : memref<1x3x128xf32, #tpu.memory_space<vmem>>, vector<1x1x128xf32>
    %94 = vector.shape_cast %93 : vector<1x1x128xf32> to vector<1x128xf32>
    %95 = vector.shape_cast %86 : vector<1x128xf32> to vector<1x1x128xf32>
    tpu.vector_store %arg4[%c0_27, %c2, %c0_28], %95 {strides = array<i32>} : memref<1x3x128xf32, #tpu.memory_space<vmem>>, vector<1x1x128xf32>,
    return
  }
  func.func @transform_0(%arg0: i32, %arg1: i32) -> (i32, i32) {
    %c1_i32 = arith.constant 1 : i32
    %0 = arith.muli %arg0, %c1_i32 : i32
    %1 = arith.addi %0, %arg1 : i32
    %c0_i32 = arith.constant 0 : i32
    %c0_i32_0 = arith.constant 0 : i32
    return %1, %c0_i32 : i32, i32
  }
  func.func @transform_1(%arg0: i32, %arg1: i32) -> (i32, i32) {
    %c1_i32 = arith.constant 1 : i32
    %0 = arith.muli %arg0, %c1_i32 : i32
    %1 = arith.addi %0, %arg1 : i32
    %c0_i32 = arith.constant 0 : i32
    %c0_i32_0 = arith.constant 0 : i32
    return %1, %c0_i32 : i32, i32
  }
  func.func @transform_2(%arg0: i32, %arg1: i32) -> (i32, i32, i32) {
    %c0_i32 = arith.constant 0 : i32
    %c0_i32_0 = arith.constant 0 : i32
    %c0_i32_1 = arith.constant 0 : i32
    return %arg0, %c0_i32, %c0_i32_0 : i32, i32, i32
  }
}

</mosaic_0001>

<bundles_post_ra>
// kernel: tile.10
= control target key start
LH: loop header
LB: loop body
LE: loop exit
PB: predicated region body
PF: predicated region fallthrough
CT: control target
= control target key end

     0   :  { %s112_s0 = inlined_call_operand.vmem [shape: f32[8], index: 0, kind: input, shape index: {}]   ;;  %s113_s1 = inlined_call_operand.vmem [shape: f32[126,8], index: 1, kind: output, shape index: {}]  }
   0x1   :  { %v4_v0 = vld [vmem:[%s112_s0] ss:$0 sm:$0xff] }
   0x2   :  { %5 = vst [vmem:[%s113_s1] sm:$0xff] %v4_v0  ;;  %36 = vst [vmem:[%s113_s1 + $0x8] sm:$0xff] %v4_v0 }
   0x3   :  { %37 = vst [vmem:[%s113_s1 + $0x10] sm:$0xff] %v4_v0  ;;  %38 = vst [vmem:[%s113_s1 + $0x18] sm:$0xff] %v4_v0 }
   0x4   :  { %39 = vst [vmem:[%s113_s1 + $0x20] sm:$0xff] %v4_v0  ;;  %40 = vst [vmem:[%s113_s1 + $0x28] sm:$0xff] %v4_v0 }
   0x5   :  { %41 = vst [vmem:[%s113_s1 + $0x30] sm:$0xff] %v4_v0  ;;  %42 = vst [vmem:[%s113_s1 + $0x38] sm:$0xff] %v4_v0 }
   0x6   :  { %43 = vst [vmem:[%s113_s1 + $0x40] sm:$0xff] %v4_v0  ;;  %44 = vst [vmem:[%s113_s1 + $0x48] sm:$0xff] %v4_v0 }
   0x7   :  { %45 = vst [vmem:[%s113_s1 + $0x50] sm:$0xff] %v4_v0  ;;  %46 = vst [vmem:[%s113_s1 + $0x58] sm:$0xff] %v4_v0 }
   0x8   :  { %47 = vst [vmem:[%s113_s1 + $0x60] sm:$0xff] %v4_v0  ;;  %48 = vst [vmem:[%s113_s1 + $0x68] sm:$0xff] %v4_v0 }
   0x9   :  { %49 = vst [vmem:[%s113_s1 + $0x70] sm:$0xff] %v4_v0  ;;  %50 = vst [vmem:[%s113_s1 + $0x78] sm:$0xff] %v4_v0 }

// kernel: tile.11
= control target key start
LH: loop header
LB: loop body
LE: loop exit
PB: predicated region body
PF: predicated region fallthrough
CT: control target
= control target key end

     0   :  { %vm6_vm0 = vcmask 1043458   ;;  %vm10_vm1 = vcmask 1045508   ;;  %s19_s6 = smov 3  ;;  %s22_s7 = smov 12  ;;  %vm33_vm2 = vcmask 1046534   ;;  %vm14_vm3 = vcmask 1047558   ;;  %s734_s0 = inlined_call_operand.vmem [shape: f32[126,8], index: 0, kind: input, shape index: {}]   ;;  %s735_s1 = inlined_call_operand.vmem [shape: f32[1008], index: 1, kind: output, shape index: {}]  }
   0x1   :  { %v346_v0 = vld [vmem:[%s734_s0 + $0xf] ss:$16 sm:%s19_s6]   ;;  %s27_s12 = smov 48  ;;  %s61_s17 = smov 3  ;;  %v353_v14 = vld [vmem:[%s734_s0 + $0x68] sm:$0x40]  }
   0x2   :  { %v347_v1 = vld [vmem:[%s734_s0 + $0xf] ss:$16 sm:%s22_s7]   ;;  %s64_s18 = smov 12  ;;  %v354_v6 = vld [vmem:[%s734_s0 + $0xd] ss:$16 sm:%s61_s17]   ;;  %s69_s23 = smov 48 }
   0x3   :  { %v25_v2 = vsel %vm6_vm0, %v347_v1, %v346_v0  ;;  %v348_v3 = vld [vmem:[%s734_s0 + $0xf] ss:$16 sm:%s27_s12]   ;;  %v355_v7 = vld [vmem:[%s734_s0 + $0xd] ss:$16 sm:%s64_s18]   ;;  %s74_s24 = smov 192  ;;  %s40_s29 = smov 3 }
   0x4   :  { %v349_v4 = vld [vmem:[%s734_s0 + $0x69] sm:$0x40]   ;;  %v30_v5 = vsel %vm10_vm1, %v348_v3, %v25_v2  ;;  %v67_v9 = vsel %vm6_vm0, %v355_v7, %v354_v6  ;;  %v356_v10 = vld [vmem:[%s734_s0 + $0xd] ss:$16 sm:%s69_s23]   ;;  %s421_s30 = smov 120   ;;  %s43_s4 = smov 12 }
   0x5   :  { %v34_v8 = vsel %vm33_vm2, %v349_v4, %v30_v5  ;;  %v357_v11 = vld [vmem:[%s734_s0 + $0xd] ss:$16 sm:%s74_s24]   ;;  %v72_v12 = vsel %vm10_vm1, %v356_v10, %v67_v9  ;;  %v350_v13 = vld [vmem:[%s734_s0 + $0xe] ss:$16 sm:%s40_s29]   ;;  %s48_s5 = smov 48  ;;  %s83_s12 = smov 3 }
   0x6   :  { %35 = vrot.lane.b32.xlu0 %v34_v8, %s421_s30  ;;  %v77_v15 = vsel %vm14_vm3, %v357_v11, %v72_v12  ;;  %v351_v16 = vld [vmem:[%s734_s0 + $0xe] ss:$16 sm:%s43_s4]   ;;  %s422_s13 = smov 104   ;;  %s86_s16 = smov 12  ;;  %vm16_vm4 = vcmask 64512   ;;  %vm37_vm5 = vcmask 1048512  }
   0x7   :  { %v352_v17 = vld [vmem:[%s734_s0 + $0xe] ss:$16 sm:%s48_s5]   ;;  %78 = vrot.lane.b32.xlu1 %v77_v15, %s422_s13  ;;  %v46_v18 = vsel %vm6_vm0, %v351_v16, %v350_v13  ;;  %s91_s17 = smov 48  ;;  %s96_s22 = smov 192  ;;  %vm58_vm6 = vcmask 982912   ;;  %vm80_vm7 = vcmask 917312  }
   0x8   :  { %v358_v19 = vld [vmem:[%s734_s0 + $0xc] ss:$16 sm:%s83_s12]   ;;  %v51_v20 = vsel %vm10_vm1, %v352_v17, %v46_v18  ;;  %s105_s25 = smov 3  ;;  %s108_s26 = smov 12  ;;  %vm102_vm8 = vcmask 851712   ;;  %vm124_vm9 = vcmask 786112  }
   0x9   :  { %v359_v21 = vld [vmem:[%s734_s0 + $0xc] ss:$16 sm:%s86_s16]   ;;  %v55_v23 = vsel %vm33_vm2, %v353_v14, %v51_v20  ;;  %s423_s27 = smov 112   ;;  %v362_v27 = vld [vmem:[%s734_s0 + $0xb] ss:$16 sm:%s105_s25]   ;;  %s113_s30 = smov 48 }
   0xa   :  { %v360_v22 = vld [vmem:[%s734_s0 + $0xc] ss:$16 sm:%s91_s17]   ;;  %v89_v24 = vsel %vm6_vm0, %v359_v21, %v358_v19  ;;  %56 = vrot.lane.b32.xlu0 %v55_v23, %s423_s27  ;;  %s118_s2 = smov 192  ;;  %s127_s7 = smov 3  ;;  %vm146_vm10 = vcmask 720512   ;;  %vm168_vm11 = vcmask 654912  }
   0xb   :  { %v361_v25 = vld [vmem:[%s734_s0 + $0xc] ss:$16 sm:%s96_s22]   ;;  %v94_v26 = vsel %vm10_vm1, %v360_v22, %v89_v24  ;;  %v363_v29 = vld [vmem:[%s734_s0 + $0xb] ss:$16 sm:%s108_s26]   ;;  %s424_s8 = smov 96   ;;  %s130_s11 = smov 12 }
   0xc   :  { %v99_v28 = vsel %vm14_vm3, %v361_v25, %v94_v26  ;;  %v364_v30 = vld [vmem:[%s734_s0 + $0xb] ss:$16 sm:%s113_s30]   ;;  %v111_v31 = vsel %vm6_vm0, %v363_v29, %v362_v27  ;;  %s135_s12 = smov 48  ;;  %v366_v34 = vld [vmem:[%s734_s0 + $0xa] ss:$16 sm:%s127_s7]   ;;  %s140_s17 = smov 192 }
   0xd   :  { %100 = vrot.lane.b32.xlu1 %v99_v28, %s424_s8  ;;  %v365_v32 = vld [vmem:[%s734_s0 + $0xb] ss:$16 sm:%s118_s2]   ;;  %v116_v33 = vsel %vm10_vm1, %v364_v30, %v111_v31  ;;  %s149_s22 = smov 3  ;;  %s152_s23 = smov 12  ;;  %vm190_vm12 = vcmask 589312   ;;  %vm212_vm13 = vcmask 523712  }
   0xe   :  { %v367_v35 = vld [vmem:[%s734_s0 + $0xa] ss:$16 sm:%s130_s11]   ;;  %v121_v36 = vsel %vm14_vm3, %v365_v32, %v116_v33  ;;  %s425_s24 = smov 88   ;;  %v370_v41 = vld [vmem:[%s734_s0 + $0x9] ss:$16 sm:%s149_s22]   ;;  %s157_s27 = smov 48 }
   0xf   :  { %v133_v37 = vsel %vm6_vm0, %v367_v35, %v366_v34  ;;  %v368_v38 = vld [vmem:[%s734_s0 + $0xa] ss:$16 sm:%s135_s12]   ;;  %122 = vrot.lane.b32.xlu0 %v121_v36, %s425_s24  ;;  %s162_s28 = smov 192  ;;  %s171_s4 = smov 3  ;;  %vm234_vm14 = vcmask 458112   ;;  %vm256_vm15 = vcmask 392512  }
  0x10   :  { %v369_v39 = vld [vmem:[%s734_s0 + $0xa] ss:$16 sm:%s140_s17]   ;;  %v138_v40 = vsel %vm10_vm1, %v368_v38, %v133_v37  ;;  %v371_v43 = vld [vmem:[%s734_s0 + $0x9] ss:$16 sm:%s152_s23]   ;;  %s426_s5 = smov 80   ;;  %s174_s8 = smov 12 }
  0x11   :  { %v143_v42 = vsel %vm14_vm3, %v369_v39, %v138_v40  ;;  %v372_v44 = vld [vmem:[%s734_s0 + $0x9] ss:$16 sm:%s157_s27]   ;;  %v155_v45 = vsel %vm6_vm0, %v371_v43, %v370_v41  ;;  %s179_s9 = smov 48  ;;  %v374_v48 = vld [vmem:[%s734_s0 + $0x8] ss:$16 sm:%s171_s4]   ;;  %s184_s14 = smov 192 }
  0x12   :  { %144 = vrot.lane.b32.xlu1 %v143_v42, %s426_s5  ;;  %v373_v46 = vld [vmem:[%s734_s0 + $0x9] ss:$16 sm:%s162_s28]   ;;  %v160_v47 = vsel %vm10_vm1, %v372_v44, %v155_v45  ;;  %s193_s19 = smov 3  ;;  %s196_s20 = smov 12  ;;  %vm322_vm2 = vcmask 195712  }
  0x13   :  { %v375_v49 = vld [vmem:[%s734_s0 + $0x8] ss:$16 sm:%s174_s8]   ;;  %v165_v50 = vsel %vm14_vm3, %v373_v46, %v160_v47  ;;  %s427_s21 = smov 72   ;;  %v378_v55 = vld [vmem:[%s734_s0 + $0x7] ss:$16 sm:%s193_s19]   ;;  %s201_s24 = smov 48 }
  0x14   :  { %v177_v51 = vsel %vm6_vm0, %v375_v49, %v374_v48  ;;  %v376_v52 = vld [vmem:[%s734_s0 + $0x8] ss:$16 sm:%s179_s9]   ;;  %166 = vrot.lane.b32.xlu0 %v165_v50, %s427_s21  ;;  %s206_s25 = smov 192  ;;  %s215_s30 = smov 3 }
  0x15   :  { %v377_v53 = vld [vmem:[%s734_s0 + $0x8] ss:$16 sm:%s184_s14]   ;;  %v182_v54 = vsel %vm10_vm1, %v376_v52, %v177_v51  ;;  %v379_v57 = vld [vmem:[%s734_s0 + $0x7] ss:$16 sm:%s196_s20]   ;;  %s428_s2 = smov 64   ;;  %s218_s5 = smov 12 }
  0x16   :  { %v187_v56 = vsel %vm14_vm3, %v377_v53, %v182_v54  ;;  %v380_v58 = vld [vmem:[%s734_s0 + $0x7] ss:$16 sm:%s201_s24]   ;;  %v199_v59 = vsel %vm6_vm0, %v379_v57, %v378_v55  ;;  %s223_s6 = smov 48  ;;  %v382_v62 = vld [vmem:[%s734_s0 + $0x6] ss:$16 sm:%s215_s30]   ;;  %s228_s11 = smov 192 }
  0x17   :  { %188 = vrot.lane.b32.xlu1 %v187_v56, %s428_s2  ;;  %v381_v60 = vld [vmem:[%s734_s0 + $0x7] ss:$16 sm:%s206_s25]   ;;  %v204_v61 = vsel %vm10_vm1, %v380_v58, %v199_v59  ;;  %s237_s16 = smov 3  ;;  %s240_s17 = smov 12 }
  0x18   :  { %v383_v63 = vld [vmem:[%s734_s0 + $0x6] ss:$16 sm:%s218_s5]   ;;  %v209_v0 = vsel %vm14_vm3, %v381_v60, %v204_v61  ;;  %s429_s18 = smov 56   ;;  %v386_v5 = vld [vmem:[%s734_s0 + $0x5] ss:$16 sm:%s237_s16]   ;;  %s245_s21 = smov 48 }
  0x19   :  { %v221_v1 = vsel %vm6_vm0, %v383_v63, %v382_v62  ;;  %v384_v2 = vld [vmem:[%s734_s0 + $0x6] ss:$16 sm:%s223_s6]   ;;  %210 = vrot.lane.b32.xlu0 %v209_v0, %s429_s18  ;;  %s250_s22 = smov 192  ;;  %s259_s27 = smov 3 }
  0x1a   :  { %v385_v3 = vld [vmem:[%s734_s0 + $0x6] ss:$16 sm:%s228_s11]   ;;  %v226_v4 = vsel %vm10_vm1, %v384_v2, %v221_v1  ;;  %v387_v7 = vld [vmem:[%s734_s0 + $0x5] ss:$16 sm:%s240_s17]   ;;  %s430_s28 = smov 48   ;;  %s262_s2 = smov 12 }
  0x1b   :  { %v231_v6 = vsel %vm14_vm3, %v385_v3, %v226_v4  ;;  %v388_v8 = vld [vmem:[%s734_s0 + $0x5] ss:$16 sm:%s245_s21]   ;;  %v243_v9 = vsel %vm6_vm0, %v387_v7, %v386_v5  ;;  %s267_s3 = smov 48  ;;  %v390_v12 = vld [vmem:[%s734_s0 + $0x4] ss:$16 sm:%s259_s27]   ;;  %s272_s8 = smov 192 }
  0x1c   :  { %232 = vrot.lane.b32.xlu1 %v231_v6, %s430_s28  ;;  %v389_v10 = vld [vmem:[%s734_s0 + $0x5] ss:$16 sm:%s250_s22]   ;;  %v248_v11 = vsel %vm10_vm1, %v388_v8, %v243_v9  ;;  %s281_s13 = smov 3  ;;  %s284_s14 = smov 12 }
  0x1d   :  { %v391_v13 = vld [vmem:[%s734_s0 + $0x4] ss:$16 sm:%s262_s2]   ;;  %v253_v14 = vsel %vm14_vm3, %v389_v10, %v248_v11  ;;  %s431_s15 = smov 40   ;;  %v394_v19 = vld [vmem:[%s734_s0 + $0x3] ss:$16 sm:%s281_s13]   ;;  %s289_s18 = smov 48 }
  0x1e   :  { %v265_v15 = vsel %vm6_vm0, %v391_v13, %v390_v12  ;;  %v392_v16 = vld [vmem:[%s734_s0 + $0x4] ss:$16 sm:%s267_s3]   ;;  %254 = vrot.lane.b32.xlu0 %v253_v14, %s431_s15  ;;  %s294_s19 = smov 192  ;;  %s303_s24 = smov 3 }
  0x1f   :  { %v393_v17 = vld [vmem:[%s734_s0 + $0x4] ss:$16 sm:%s272_s8]   ;;  %v270_v18 = vsel %vm10_vm1, %v392_v16, %v265_v15  ;;  %v395_v21 = vld [vmem:[%s734_s0 + $0x3] ss:$16 sm:%s284_s14]   ;;  %s432_s25 = smov 32   ;;  %s306_s28 = smov 12 }
  0x20   :  { %v275_v20 = vsel %vm14_vm3, %v393_v17, %v270_v18  ;;  %v396_v22 = vld [vmem:[%s734_s0 + $0x3] ss:$16 sm:%s289_s18]   ;;  %v287_v23 = vsel %vm6_vm0, %v395_v21, %v394_v19  ;;  %s311_s29 = smov 48  ;;  %v398_v26 = vld [vmem:[%s734_s0 + $0x2] ss:$16 sm:%s303_s24]   ;;  %s316_s5 = smov 192 }
  0x21   :  { %276 = vrot.lane.b32.xlu1 %v275_v20, %s432_s25  ;;  %v397_v24 = vld [vmem:[%s734_s0 + $0x3] ss:$16 sm:%s294_s19]   ;;  %v292_v25 = vsel %vm10_vm1, %v396_v22, %v287_v23  ;;  %s325_s10 = smov 3  ;;  %s328_s11 = smov 12 }
  0x22   :  { %v399_v27 = vld [vmem:[%s734_s0 + $0x2] ss:$16 sm:%s306_s28]   ;;  %v297_v28 = vsel %vm14_vm3, %v397_v24, %v292_v25  ;;  %s433_s12 = smov 24   ;;  %v402_v33 = vld [vmem:[%s734_s0 + $0x1] ss:$16 sm:%s325_s10]   ;;  %s333_s15 = smov 48 }
  0x23   :  { %v309_v29 = vsel %vm6_vm0, %v399_v27, %v398_v26  ;;  %v400_v30 = vld [vmem:[%s734_s0 + $0x2] ss:$16 sm:%s311_s29]   ;;  %298 = vrot.lane.b32.xlu0 %v297_v28, %s433_s12  ;;  %s338_s16 = smov 192  ;;  %s2_s21 = smov 3 }
  0x24   :  { %v401_v31 = vld [vmem:[%s734_s0 + $0x2] ss:$16 sm:%s316_s5]   ;;  %v314_v32 = vsel %vm10_vm1, %v400_v30, %v309_v29  ;;  %v403_v35 = vld [vmem:[%s734_s0 + $0x1] ss:$16 sm:%s328_s11]   ;;  %s434_s22 = smov 16   ;;  %s4_s25 = smov 12 }
  0x25   :  { %v319_v34 = vsel %vm14_vm3, %v401_v31, %v314_v32  ;;  %v404_v36 = vld [vmem:[%s734_s0 + $0x1] ss:$16 sm:%s333_s15]   ;;  %v331_v37 = vsel %vm6_vm0, %v403_v35, %v402_v33  ;;  %s8_s26 = smov 48  ;;  %s12_s27 = smov 192  ;;  %v3_v40 = vld [vmem:[%s734_s0] ss:$16 sm:%s2_s21]  }
  0x26   :  { %320 = vrot.lane.b32.xlu1 %v319_v34, %s434_s22  ;;  %v405_v38 = vld [vmem:[%s734_s0 + $0x1] ss:$16 sm:%s338_s16]   ;;  %v336_v39 = vsel %vm10_vm1, %v404_v36, %v331_v37 }
  0x27   :  { %v5_v41 = vld [vmem:[%s734_s0] ss:$16 sm:%s4_s25]   ;;  %v341_v42 = vsel %vm14_vm3, %v405_v38, %v336_v39 }
  0x28   :  { %v7_v43 = vsel %vm6_vm0, %v5_v41, %v3_v40  ;;  %v9_v44 = vld [vmem:[%s734_s0] ss:$16 sm:%s8_s26]   ;;  %vm278_vm0 = vcmask 326912  }
  0x29   :  { %v13_v45 = vld [vmem:[%s734_s0] ss:$16 sm:%s12_s27]   ;;  %s435_s0 = smov 8   ;;  %v11_v46 = vsel %vm10_vm1, %v9_v44, %v7_v43  ;;  %vm300_vm1 = vcmask 261312  }
  0x2a   :  { %342 = vrot.lane.b32.xlu0 %v341_v42, %s435_s0  ;;  %v15_v47 = vsel %vm14_vm3, %v13_v45, %v11_v46  ;;  %vm344_vm3 = vcmask 130112  }
  0x2b   :  { %17 = vst.msk [vmem:[%s735_s1] sm:$0xff] %vm16_vm4, %v15_v47  }
  0x78   :  { %v36_v48 = vpop.permute.xlu0 %35  }
  0x79   :  { %38 = vst.msk [vmem:[%s735_s1] sm:$0x7f] %vm37_vm5, %v36_v48   ;;  %v79_v49 = vpop.permute.xlu1 %78  }
  0x7c   :  { %v57_v50 = vpop.permute.xlu0 %56  }
  0x7d   :  { %59 = vst.msk [vmem:[%s735_s1] sm:$0x7f] %vm58_vm6, %v57_v50  }
  0x7e   :  { %81 = vst.msk [vmem:[%s735_s1] sm:$0xff] %vm80_vm7, %v79_v49  }
  0x7f   :  { %v101_v51 = vpop.permute.xlu1 %100  }
  0x80   :  { %103 = vst.msk [vmem:[%s735_s1] sm:$0xff] %vm102_vm8, %v101_v51  }
  0x81   :  { %v123_v52 = vpop.permute.xlu0 %122  }
  0x82   :  { %125 = vst.msk [vmem:[%s735_s1] sm:$0xff] %vm124_vm9, %v123_v52  }
  0x84   :  { %v145_v53 = vpop.permute.xlu1 %144  }
  0x85   :  { %147 = vst.msk [vmem:[%s735_s1] sm:$0xff] %vm146_vm10, %v145_v53  }
  0x86   :  { %v167_v54 = vpop.permute.xlu0 %166  }
  0x87   :  { %169 = vst.msk [vmem:[%s735_s1] sm:$0xff] %vm168_vm11, %v167_v54  }
  0x89   :  { %v189_v55 = vpop.permute.xlu1 %188  }
  0x8a   :  { %191 = vst.msk [vmem:[%s735_s1] sm:$0xff] %vm190_vm12, %v189_v55  }
  0x8b   :  { %v211_v56 = vpop.permute.xlu0 %210  }
  0x8c   :  { %213 = vst.msk [vmem:[%s735_s1] sm:$0xff] %vm212_vm13, %v211_v56  }
  0x8e   :  { %v233_v57 = vpop.permute.xlu1 %232  }
  0x8f   :  { %235 = vst.msk [vmem:[%s735_s1] sm:$0xff] %vm234_vm14, %v233_v57  }
  0x90   :  { %v255_v58 = vpop.permute.xlu0 %254  }
  0x91   :  { %257 = vst.msk [vmem:[%s735_s1] sm:$0xff] %vm256_vm15, %v255_v58  }
  0x93   :  { %v277_v59 = vpop.permute.xlu1 %276  }
  0x94   :  { %279 = vst.msk [vmem:[%s735_s1] sm:$0xff] %vm278_vm0, %v277_v59  }
  0x95   :  { %v299_v60 = vpop.permute.xlu0 %298  }
  0x96   :  { %301 = vst.msk [vmem:[%s735_s1] sm:$0xff] %vm300_vm1, %v299_v60  }
  0x98   :  { %v321_v61 = vpop.permute.xlu1 %320  }
  0x99   :  { %323 = vst.msk [vmem:[%s735_s1] sm:$0xff] %vm322_vm2, %v321_v61  }
  0x9c   :  { %v343_v62 = vpop.permute.xlu0 %342  }
  0x9d   :  { %345 = vst.msk [vmem:[%s735_s1] sm:$0xff] %vm344_vm3, %v343_v62  }

// kernel: custom_loss.1
= control target key start
LH: loop header
LB: loop body
LE: loop exit
PB: predicated region body
PF: predicated region fallthrough
CT: control target
= control target key end

     0   :  { %v47_v0 = vlaneseq  ;;  %s183_s13 = smov 1   ;;  %v184_v15 = vmov 0.0   ;;  %s185_s16 = smov 2   ;;  %v186_v63 = vmov 0   ;;  %s219_s0 = inlined_call_operand.vmem [shape: f32[8,128], index: 0, kind: input, shape index: {}]   ;;  %s220_s1 = inlined_call_operand.vmem [shape: f32[8,128], index: 1, kind: input, shape index: {}]   ;;  %s221_s2 = inlined_call_operand.vmem [shape: f32[1,3,128], index: 2, kind: output, shape index: {}]  }
   0x1   :  { %v45_v1 = vld [vmem:[%s219_s0] sm:$0xff] }
   0x2   :  { %v46_v2 = vld [vmem:[%s220_s1] sm:$0xff]  ;;  %v88_v3 = vmul.f32 %v45_v1, %v45_v1  ;;  %v130_v4 = vand.u32 2147483647, %v45_v1  ;;  %v48_v7 = vand.u32 127, %v47_v0  ;;  %v128_v27 = vmax.f32 %v45_v1, 0.0 }
   0x3   :  { %v102_v5 = vmul.f32 %v46_v2, %v45_v1  ;;  %v72_v6 = vsub.f32 %v45_v1, %v46_v2  ;;  %v95_v9 = vmul.f32 %v46_v2, %v46_v2  ;;  %v117_v59 = vshrl.u32 %v47_v0, 7 }
   0x4   :  { %v131_v8 = vsub.f32 0.0, %v130_v4  ;;  %89 = vrot.lane.b32.xlu0 %v88_v3, %s183_s13  ;;  %v53_v11 = vand.u32 7, %v48_v7 }
   0x5   :  { %103 = vrot.lane.b32.xlu1 %v102_v5, %s183_s13  ;;  %v73_v10 = vmul.f32 %v72_v6, %v72_v6  ;;  %v129_v31 = vsub.f32 %v128_v27, %v102_v5  ;;  %v118_v61 = vsub.s32 0, %v117_v59 }
   0x6   :  { %v132_v12 = vmul.f32 1.442695, %v131_v8  ;;  %vm67_vm0 = vcmp.ge.s32.totalorder %v53_v11, 3  ;;  %vm68_vm1 = vcmp.le.s32.totalorder %v53_v11, 6  ;;  %vm61_vm3 = vcmp.lt.s32.totalorder %v53_v11, 3 }
   0x7   :  { %v74_v13 = vrot.slane %v73_v10, 4  ;;  %vm69_vm2 = vmand %vm67_vm0, %vm68_vm1  ;;  %v170_v20 = vsel %vm61_vm3, 1.0, %v184_v15  ;;  %vm64_vm5 = vcmp.eq.s32.totalorder %v53_v11, 7 }
   0x8   :  { %177 = vpow2.f32 %v132_v12  ;;  %96 = vrot.lane.b32.xlu0 %v95_v9, %s183_s13  ;;  %v172_v16 = vsel %vm69_vm2, 1.0, %v184_v15  ;;  %v171_v40 = vsel %vm64_vm5, 1.0, %v184_v15 }
   0x9   :  { %v75_v14 = vadd.f32 %v74_v13, %v73_v10  ;;  %81 = vrot.lane.b32.xlu1 %v172_v16, %s183_s13 }
   0xb   :  { %v76_v17 = vrot.slane %v75_v14, 2 }
   0xd   :  { %v77_v18 = vadd.f32 %v76_v17, %v75_v14 }
   0xf   :  { %v78_v19 = vrot.slane %v77_v18, 1 }
  0x11   :  { %v79_v21 = vadd.f32 %v78_v19, %v77_v18 }
  0x12   :  { %v178_v22 = vpop.eup %177 }
  0x13   :  { %v134_v23 = vadd.f32 1.0, %v178_v22  ;;  %v80_v24 = vmul.f32 %v170_v20, %v79_v21  ;;  %v137_v25 = vmul.f32 -0.5, %v178_v22  ;;  %v140_v28 = vand.u32 2147483647, %v178_v22 }
  0x15   :  { %179 = vlog2.f32 %v134_v23  ;;  %151 = vst [vmem:[%s221_s2] sm:$0x1] %v80_v24  ;;  %v138_v26 = vadd.f32 1.0, %v137_v25  ;;  %vm141_vm4 = vcmp.lt.f32.partialorder %v140_v28, 0.0004427343 }
  0x17   :  { %v139_v29 = vmul.f32 %v178_v22, %v138_v26 }
  0x1f   :  { %v180_v30 = vpop.eup %179 }
  0x20   :  { %v136_v32 = vmul.f32 0.6931472, %v180_v30 }
  0x22   :  { %v142_v33 = vsel %vm141_vm4, %v139_v29, %v136_v32 }
  0x23   :  { %v143_v34 = vadd.f32 %v142_v33, %v129_v31 }
  0x25   :  { %v144_v35 = vrot.slane %v143_v34, 4 }
  0x27   :  { %v145_v36 = vadd.f32 %v144_v35, %v143_v34 }
  0x29   :  { %v146_v37 = vrot.slane %v145_v36, 2 }
  0x2b   :  { %v147_v38 = vadd.f32 %v146_v37, %v145_v36 }
  0x2d   :  { %v148_v39 = vrot.slane %v147_v38, 1 }
  0x2f   :  { %v149_v41 = vadd.f32 %v148_v39, %v147_v38 }
  0x31   :  { %v150_v42 = vmul.f32 %v171_v40, %v149_v41 }
  0x33   :  { %153 = vst [vmem:[%s221_s2 + $0x2] sm:$0x1] %v150_v42 }
  0x76   :  { %v90_v43 = vpop.permute.xlu0 %89 }
  0x77   :  { %v104_v44 = vpop.permute.xlu1 %103  ;;  %v91_v45 = vadd.f32 %v90_v43, %v88_v3 }
  0x78   :  { %v105_v46 = vadd.f32 %v104_v44, %v102_v5 }
  0x79   :  { %92 = vrot.lane.b32.xlu0 %v91_v45, %s185_s16 }
  0x7a   :  { %v97_v47 = vpop.permute.xlu0 %96 }
  0x7b   :  { %v98_v48 = vadd.f32 %v97_v47, %v95_v9  ;;  %v82_v49 = vpop.permute.xlu1 %81 }
  0x7c   :  { %v83_v50 = vadd.f32 %v172_v16, %v82_v49 }
  0x7d   :  { %106 = vrot.lane.b32.xlu0 %v105_v46, %s185_s16  ;;  %99 = vrot.lane.b32.xlu1 %v98_v48, %s185_s16 }
  0x81   :  { %84 = vrot.lane.b32.xlu1 %v83_v50, %s185_s16 }
  0xeb   :  { %v93_v51 = vpop.permute.xlu0 %92 }
  0xec   :  { %v94_v53 = vadd.f32 %v93_v51, %v91_v45 }
  0xef   :  { %v100_v52 = vpop.permute.xlu1 %99  ;;  %v107_v60 = vpop.permute.xlu0 %106 }
  0xf0   :  { %v101_v54 = vadd.f32 %v100_v52, %v98_v48  ;;  %v108_v62 = vadd.f32 %v107_v60, %v105_v46 }
  0xf2   :  { %v109_v55 = vmul.f32 %v101_v54, %v94_v53 }
  0xf3   :  { %v85_v57 = vpop.permute.xlu1 %84 }
  0xf4   :  { %v110_v56 = vadd.f32 1e-12, %v109_v55  ;;  %v86_v58 = vadd.f32 %v85_v57, %v83_v50 }
  0xf6   :  { %181 = vrsqrt.f32 %v110_v56  ;;  %vm87_vm6 = vcmp.eq.f32.partialorder %v86_v58, 4.0 }
  0xf7   :  { %v115_v1 = vsel %vm87_vm6, 1, %v186_v63 }
  0xf8   :  { %v119_v4 = vrot.slane %v115_v1, %v118_v61 }
  0xfa   :  { %vm120_vm7 = vcmp.eq.s32.totalorder %v119_v4, 1 }
 0x100   :  { %v182_v2 = vpop.eup %181 }
 0x101   :  { %v112_v3 = vmul.f32 %v182_v2, %v108_v62 }
 0x103   :  { %v113_v5 = vmul.f32 %v112_v3, %v112_v3 }
 0x105   :  { %v114_v6 = vsub.f32 1.0, %v113_v5 }
 0x107   :  { %v121_v7 = vsel %vm120_vm7, %v114_v6, 0.0 }
 0x108   :  { %v122_v8 = vrot.slane %v121_v7, 4 }
 0x10a   :  { %v123_v9 = vadd.f32 %v122_v8, %v121_v7 }
 0x10c   :  { %v124_v10 = vrot.slane %v123_v9, 2 }
 0x10e   :  { %v125_v11 = vadd.f32 %v124_v10, %v123_v9 }
 0x110   :  { %v126_v12 = vrot.slane %v125_v11, 1 }
 0x112   :  { %v127_v13 = vadd.f32 %v126_v12, %v125_v11 }
 0x114   :  { %152 = vst [vmem:[%s221_s2 + $0x1] sm:$0x1] %v127_v13 }

</bundles_post_ra>
